<compile_context>
chip_gen: v7x
topology: tpu7x:2x2x1
jax: 0.10.0
libtpu: 0.0.40
codegen_flags: <defaults>
</compile_context>

<pallas_src>
import functools
import math

import jax
import jax.numpy as jnp
from jax import lax
from jax.experimental import pallas as pl
from jax.experimental.pallas import tpu as pltpu


def _round_up(a, b):
    return -(-a // b) * b


def _cdiv(a, b):
    return -(-a // b)


def _vmem_budget_bytes():
    """Returns (working-set budget, vmem_limit cap), generation aware."""
    cap = None
    try:
        cap = getattr(pltpu.get_tpu_info(), "vmem_capacity_bytes", None)
    except Exception:
        cap = None
    if cap is None or cap <= 64 * 1024 * 1024:
        # v7x (64 MiB physical per TensorCore) or unknown: leave headroom for
        # the compiler's internal scratch and pipeline buffers.
        return 32 * 1024 * 1024, 46 * 1024 * 1024
    # v5e / v6e: 128 MiB physical VMEM.
    return 88 * 1024 * 1024, 112 * 1024 * 1024


def _token_conv_kernel(x_ref, w_ref, b_ref, o_ref, *, kh_steps, compute_dtype):
    """One m grid step.

    x_ref : (MB, K, OW, K*D)   MB (b, oh)-tiles, original dtype (cast in-kernel)
    w_ref : (KH, KW*Cin, Dp)   full weight, resident in VMEM (constant index)
    b_ref : (1, Dp)            bias, f32
    o_ref : (MB*OW, Dp)        output rows (lane-dense, sublane-aligned)
    """
    rows, dp = o_ref.shape
    # Fold the bias into the accumulator init; accumulate in f32 throughout.
    acc = jnp.broadcast_to(b_ref[...].astype(jnp.float32), (rows, dp))
    for kh in range(kh_steps):                       # short, statically unrolled
        # (MB, OW, K*D): cast to the MXU operand dtype in-kernel (VPU, ~free).
        lhs = x_ref[:, kh, :, :].astype(compute_dtype).reshape(rows, -1)
        # TODO(synk): feed the un-flattened (MB, OW, K*D) slab straight to a
        # rank-3 x rank-2 dot_general (avoids the sublane relayout this reshape
        # implies when OW % 8 != 0) once that lowering is guaranteed on Mosaic.
        acc = acc + jnp.dot(lhs, w_ref[kh], preferred_element_type=jnp.float32)
    o_ref[...] = acc.astype(o_ref.dtype)


def _pick_m_tile(boh, ow, fixed_bytes, per_mb_bytes, budget, target_rows=1024):
    """Pick MB: MB*OW a multiple of 8, MXU-filling row count, minimal tail
    padding, working set within `budget`. Returns None if nothing fits."""
    g = 8 // math.gcd(ow, 8)                # MB granularity (sublane-aligned rows)
    if fixed_bytes + g * per_mb_bytes > budget:
        return None
    mb_fit = (budget - fixed_bytes) // per_mb_bytes
    mb_desired = _round_up(max(1, _cdiv(target_rows, ow)), g)
    mb_cap = max(g, min(mb_fit, mb_desired, _round_up(boh, g)))
    mb_cap = (mb_cap // g) * g

    def best_of(cands):
        best_key, best_mb = None, None
        for mb in cands:
            pad = _cdiv(boh, mb) * mb - boh
            key = (pad, -mb)                # minimise padding, then maximise MB
            if best_key is None or key < best_key:
                best_key, best_mb = key, mb
        return best_mb

    cands = list(range(g, mb_cap + 1, g))
    mb = best_of(cands)
    # Prefer >= 2 grid tiles when the problem allows it: keeps both v7x
    # TensorCores busy and lets the pipeline overlap DMA with compute.
    multi = [m for m in cands if _cdiv(boh, m) >= 2]
    if boh > g and multi:
        mb = best_of(multi)
    return mb


def _xla_conv_forward(x, weight, bias, *, token_grid_size, stride):
    """Pure-XLA path matching the PyTorch module exactly (reference/fallback)."""
    B, T, D = x.shape
    H = W = token_grid_size
    x_nchw = jnp.transpose(x.reshape(B, H, W, D), (0, 3, 1, 2))  # b (h w) d -> b d h w
    out = lax.conv_general_dilated(
        x_nchw, weight, window_strides=(stride, stride), padding="VALID",
        dimension_numbers=("NCHW", "OIHW", "NCHW"),
    ) + bias.reshape(1, -1, 1, 1)
    Bo, Co, OH, OW = out.shape
    return jnp.transpose(out, (0, 2, 3, 1)).reshape(Bo, OH * OW, Co)


@functools.partial(
    jax.jit,
    static_argnames=("token_grid_size", "kernel_size", "stride", "compute_dtype"))
def token_conv_forward(x, weight, bias, *, token_grid_size, kernel_size, stride,
                       compute_dtype=jnp.bfloat16):
    """x: (B, T, D); weight: (Cout, Cin=D, K, K); bias: (Cout,) -> (B, T', Cout)."""
    B, T, D = x.shape
    Cout, Cin, KH, KW = weight.shape
    H = W = token_grid_size
    K, S = kernel_size, stride
    assert T == H * W and Cin == D and KH == K and KW == K and K <= H
    OH = (H - K) // S + 1
    OW = (W - K) // S + 1

    if not (S == K and H % S == 0):
        # TODO(synk): overlapping / non-exact-tiling convs (stride != kernel or
        # grid % stride != 0) are not fused; fall back to the XLA conv, which
        # matches the PyTorch module exactly.
        return _xla_conv_forward(x, weight, bias,
                                 token_grid_size=token_grid_size, stride=S)

    out_dtype = x.dtype
    cdt = jnp.dtype(compute_dtype) if compute_dtype is not None else jnp.dtype(x.dtype)
    x_isz = jnp.dtype(x.dtype).itemsize
    c_isz = cdt.itemsize
    o_isz = jnp.dtype(out_dtype).itemsize

    Dp = _round_up(Cout, 128)       # lane-dense output columns
    KD = K * D
    BOH = B * OH

    budget, vmem_cap = _vmem_budget_bytes()
    # Per-step VMEM footprint model. Weight/bias are conservatively counted as
    # double-buffered even though their block index is constant (resident).
    fixed = 2 * KH * KD * Dp * c_isz + 2 * Dp * 4
    per_mb = (2 * K * OW * KD * x_isz       # x block (double-buffered, x dtype)
              + 2 * OW * Dp * o_isz         # output block (double-buffered)
              + OW * Dp * 4)                # f32 accumulator value
    MB = _pick_m_tile(BOH, OW, fixed, per_mb, budget)
    if MB is None:
        # TODO(synk): for very large D, add a cin-reduction grid axis instead
        # of falling back to the XLA conv.
        return _xla_conv_forward(x, weight, bias,
                                 token_grid_size=token_grid_size, stride=S)

    num_tiles = _cdiv(BOH, MB)
    BOHp = num_tiles * MB

    # (B, H*W, D) -> (B*OH, K, OW, K*D): free contiguous reshape; the last axis
    # already carries the (kw, cin) im2col column order for one (oh, kh).
    # x keeps its original dtype -- the bf16 cast happens inside the kernel.
    x_r = x.reshape(BOH, K, OW, KD)
    if BOHp != BOH:
        x_r = jnp.pad(x_r, ((0, BOHp - BOH), (0, 0), (0, 0), (0, 0)))

    # (Cout, Cin, KH, KW) -> (KH, KW*Cin, Dp): rows ordered (kw, cin) to match.
    w_t = jnp.transpose(weight, (2, 3, 1, 0))                 # (KH, KW, Cin, Cout)
    if Dp != Cout:
        w_t = jnp.pad(w_t, ((0, 0), (0, 0), (0, 0), (0, Dp - Cout)))
        b_p = jnp.pad(bias, (0, Dp - Cout))
    else:
        b_p = bias
    w_mat = w_t.reshape(KH, KW * Cin, Dp).astype(cdt)
    b_mat = b_p.reshape(1, Dp).astype(jnp.float32)

    need = fixed + MB * per_mb
    vmem_limit = int(min(vmem_cap, max(need + 16 * 1024 * 1024, 32 * 1024 * 1024)))

    flops = 2 * BOHp * OW * K * K * D * Dp
    bytes_accessed = (BOHp * K * OW * KD * x_isz + w_mat.size * c_isz
                      + b_mat.size * 4 + BOHp * OW * Dp * o_isz)

    kernel = functools.partial(_token_conv_kernel, kh_steps=KH, compute_dtype=cdt)

    out2d = pl.pallas_call(
        kernel,
        out_shape=jax.ShapeDtypeStruct((BOHp * OW, Dp), out_dtype),
        grid=(num_tiles,),
        in_specs=[
            pl.BlockSpec((MB, K, OW, KD), lambda m: (m, 0, 0, 0)),
            pl.BlockSpec((KH, KW * Cin, Dp), lambda m: (0, 0, 0)),  # resident weight
            pl.BlockSpec((1, Dp), lambda m: (0, 0)),                # resident bias
        ],
        out_specs=pl.BlockSpec((MB * OW, Dp), lambda m: (m, 0)),
        compiler_params=pltpu.CompilerParams(
            dimension_semantics=("parallel",),
            vmem_limit_bytes=vmem_limit,
        ),
        cost_estimate=pl.CostEstimate(flops=flops, transcendentals=0,
                                      bytes_accessed=bytes_accessed),
    )(x_r, w_mat, b_mat)

    out = out2d[:BOH * OW, :Cout]                              # drop pad rows/cols
    return out.reshape(B, OH * OW, Cout)


if __name__ == "__main__":
    # Small config consistent with the module:
    #   visual_token_count = 64 (grid 8x8), hidden_size = 32, kernel = stride = 4
    B = 2
    D = 32                 # tower_config.hidden_size
    GRID = 8               # token_grid_size
    T = GRID * GRID        # 64 visual tokens
    K = 4                  # mm_vision_token_compression_kernel_size
    S = 4                  # mm_vision_token_compression_stride

    key = jax.random.PRNGKey(0)
    kx, kw_, kb = jax.random.split(key, 3)

    x = jax.random.normal(kx, (B, T, D), dtype=jnp.float32)
    fan_in = D * K * K
    bound = 1.0 / (fan_in ** 0.5)
    weight = jax.random.uniform(kw_, (D, D, K, K), dtype=jnp.float32,
                                minval=-bound, maxval=bound)
    bias = jax.random.uniform(kb, (D,), dtype=jnp.float32,
                              minval=-bound, maxval=bound)

    ref = _xla_conv_forward(x, weight, bias, token_grid_size=GRID, stride=S)

    # f32-operand path (bit-level-exactness-class check vs the XLA conv).
    out_f32 = token_conv_forward(x, weight, bias, token_grid_size=GRID,
                                 kernel_size=K, stride=S,
                                 compute_dtype=jnp.float32)
    out_f32 = jax.block_until_ready(out_f32)
    assert out_f32.shape == (B, (GRID // S) ** 2, D), out_f32.shape
    assert jnp.allclose(out_f32, ref, atol=1e-4, rtol=1e-4), "f32 mismatch vs reference"

    # Default path: bf16 MXU operands (cast in-kernel), f32 accumulation.
    out_bf16 = token_conv_forward(x, weight, bias, token_grid_size=GRID,
                                  kernel_size=K, stride=S)
    out_bf16 = jax.block_until_ready(out_bf16)
    assert jnp.allclose(out_bf16, ref, atol=1e-1, rtol=1e-1), "bf16 mismatch vs reference"

    # Odd batch -> exercises the padded-tail / multi-tile grid path.
    B2 = 3
    x2 = jax.random.normal(kx, (B2, T, D), dtype=jnp.float32)
    ref2 = _xla_conv_forward(x2, weight, bias, token_grid_size=GRID, stride=S)
    out2 = token_conv_forward(x2, weight, bias, token_grid_size=GRID,
                              kernel_size=K, stride=S,
                              compute_dtype=jnp.float32)
    out2 = jax.block_until_ready(out2)
    assert out2.shape == (B2, (GRID // S) ** 2, D), out2.shape
    assert jnp.allclose(out2, ref2, atol=1e-4, rtol=1e-4), "padded-tail mismatch"

    print("KERNEL_OK")
</pallas_src>

<mosaic_0001>
module attributes {stable_mosaic.version = 11 : i64} {
  func.func @_token_conv_kernel(%arg0: i32, %arg1: memref<4x4x2x128xf32, #tpu.memory_space<vmem>>, %arg2: memref<4x128x128xf32, #tpu.memory_space<vmem>>, %arg3: memref<1x128xf32, #tpu.memory_space<vmem>>, %arg4: memref<8x128xf32, #tpu.memory_space<vmem>>) attributes {dimension_semantics = [#tpu.dimension_semantics<parallel>], iteration_bounds = array<i64: 1>, scalar_prefetch = 0 : i64, scratch_operands = 0 : i64, tpu.core_type = #tpu.core_type<tc>, window_params = [{transform_indices = @transform_0, window_bounds = array<i64: 4, 4, 2, 128>}, {pipeline_mode = #tpu.pipeline_mode<synchronous>, transform_indices = @transform_1, window_bounds = array<i64: 4, 128, 128>}, {pipeline_mode = #tpu.pipeline_mode<synchronous>, transform_indices = @transform_2, window_bounds = array<i64: 1, 128>}, {transform_indices = @transform_3, window_bounds = array<i64: 8, 128>}]} {
    %c0 = arith.constant 0 : index
    %c0_0 = arith.constant 0 : index
    %0 = vector.load %arg3[%c0, %c0_0] : memref<1x128xf32, #tpu.memory_space<vmem>>, vector<1x128xf32>
    %1 = vector.shape_cast %0 : vector<1x128xf32> to vector<1x128xf32>
    %2 = vector.broadcast %1 : vector<1x128xf32> to vector<8x128xf32>
    %c0_1 = arith.constant 0 : index
    %c0_2 = arith.constant 0 : index
    %c0_3 = arith.constant 0 : index
    %c0_4 = arith.constant 0 : index
    %3 = vector.load %arg1[%c0_1, %c0_2, %c0_3, %c0_4] : memref<4x4x2x128xf32, #tpu.memory_space<vmem>>, vector<4x1x2x128xf32>
    %4 = vector.shape_cast %3 : vector<4x1x2x128xf32> to vector<4x2x128xf32>
    %5 = vector.shape_cast %4 : vector<4x2x128xf32> to vector<8x128xf32>
    %c0_5 = arith.constant 0 : index
    %c0_6 = arith.constant 0 : index
    %c0_7 = arith.constant 0 : index
    %6 = vector.load %arg2[%c0_5, %c0_6, %c0_7] : memref<4x128x128xf32, #tpu.memory_space<vmem>>, vector<1x128x128xf32>
    %7 = vector.shape_cast %6 : vector<1x128x128xf32> to vector<128x128xf32>
    %cst = arith.constant dense<0.000000e+00> : vector<8x128xf32>
    %8 = tpu.matmul %5, %7, %cst {dimension_numbers = #tpu.dot_dimension_numbers<[1], [0], [0], [1], [0, 0, 1, 1], [], []>} : vector<8x128xf32>, vector<128x128xf32>, vector<8x128xf32> -> vector<8x128xf32>
    %9 = arith.addf %2, %8 : vector<8x128xf32>
    %c0_8 = arith.constant 0 : index
    %c1 = arith.constant 1 : index
    %c0_9 = arith.constant 0 : index
    %c0_10 = arith.constant 0 : index
    %10 = vector.load %arg1[%c0_8, %c1, %c0_9, %c0_10] : memref<4x4x2x128xf32, #tpu.memory_space<vmem>>, vector<4x1x2x128xf32>
    %11 = vector.shape_cast %10 : vector<4x1x2x128xf32> to vector<4x2x128xf32>
    %12 = vector.shape_cast %11 : vector<4x2x128xf32> to vector<8x128xf32>
    %c1_11 = arith.constant 1 : index
    %c0_12 = arith.constant 0 : index
    %c0_13 = arith.constant 0 : index
    %13 = vector.load %arg2[%c1_11, %c0_12, %c0_13] : memref<4x128x128xf32, #tpu.memory_space<vmem>>, vector<1x128x128xf32>
    %14 = vector.shape_cast %13 : vector<1x128x128xf32> to vector<128x128xf32>
    %cst_14 = arith.constant dense<0.000000e+00> : vector<8x128xf32>
    %15 = tpu.matmul %12, %14, %cst_14 {dimension_numbers = #tpu.dot_dimension_numbers<[1], [0], [0], [1], [0, 0, 1, 1], [], []>} : vector<8x128xf32>, vector<128x128xf32>, vector<8x128xf32> -> vector<8x128xf32>
    %16 = arith.addf %9, %15 : vector<8x128xf32>
    %c0_15 = arith.constant 0 : index
    %c2 = arith.constant 2 : index
    %c0_16 = arith.constant 0 : index
    %c0_17 = arith.constant 0 : index
    %17 = vector.load %arg1[%c0_15, %c2, %c0_16, %c0_17] : memref<4x4x2x128xf32, #tpu.memory_space<vmem>>, vector<4x1x2x128xf32>
    %18 = vector.shape_cast %17 : vector<4x1x2x128xf32> to vector<4x2x128xf32>
    %19 = vector.shape_cast %18 : vector<4x2x128xf32> to vector<8x128xf32>
    %c2_18 = arith.constant 2 : index
    %c0_19 = arith.constant 0 : index
    %c0_20 = arith.constant 0 : index
    %20 = vector.load %arg2[%c2_18, %c0_19, %c0_20] : memref<4x128x128xf32, #tpu.memory_space<vmem>>, vector<1x128x128xf32>
    %21 = vector.shape_cast %20 : vector<1x128x128xf32> to vector<128x128xf32>
    %cst_21 = arith.constant dense<0.000000e+00> : vector<8x128xf32>
    %22 = tpu.matmul %19, %21, %cst_21 {dimension_numbers = #tpu.dot_dimension_numbers<[1], [0], [0], [1], [0, 0, 1, 1], [], []>} : vector<8x128xf32>, vector<128x128xf32>, vector<8x128xf32> -> vector<8x128xf32>
    %23 = arith.addf %16, %22 : vector<8x128xf32>
    %c0_22 = arith.constant 0 : index
    %c3 = arith.constant 3 : index
    %c0_23 = arith.constant 0 : index
    %c0_24 = arith.constant 0 : index
    %24 = vector.load %arg1[%c0_22, %c3, %c0_23, %c0_24] : memref<4x4x2x128xf32, #tpu.memory_space<vmem>>, vector<4x1x2x128xf32>
    %25 = vector.shape_cast %24 : vector<4x1x2x128xf32> to vector<4x2x128xf32>
    %26 = vector.shape_cast %25 : vector<4x2x128xf32> to vector<8x128xf32>
    %c3_25 = arith.constant 3 : index
    %c0_26 = arith.constant 0 : index
    %c0_27 = arith.constant 0 : index
    %27 = vector.load %arg2[%c3_25, %c0_26, %c0_27] : memref<4x128x128xf32, #tpu.memory_space<vmem>>, vector<1x128x128xf32>
    %28 = vector.shape_cast %27 : vector<1x128x128xf32> to vector<128x128xf32>
    %cst_28 = arith.constant dense<0.000000e+00> : vector<8x128xf32>
    %29 = tpu.matmul %26, %28, %cst_28 {dimension_numbers = #tpu.dot_dimension_numbers<[1], [0], [0], [1], [0, 0, 1, 1], [], []>} : vector<8x128xf32>, vector<128x128xf32>, vector<8x128xf32> -> vector<8x128xf32>
    %30 = arith.addf %23, %29 : vector<8x128xf32>
    %c0_29 = arith.constant 0 : index
    %c0_30 = arith.constant 0 : index
    %31 = vector.load %arg4[%c0_29, %c0_30] : memref<8x128xf32, #tpu.memory_space<vmem>>, vector<8x128xf32>
    tpu.vector_store %arg4[%c0_29, %c0_30], %30 {strides = array<i32>} : memref<8x128xf32, #tpu.memory_space<vmem>>, vector<8x128xf32>,
    return
  }
  func.func @transform_0(%arg0: i32) -> (i32, i32, i32, i32) {
    %c0_i32 = arith.constant 0 : i32
    %c0_i32_0 = arith.constant 0 : i32
    %c0_i32_1 = arith.constant 0 : i32
    %c0_i32_2 = arith.constant 0 : i32
    return %arg0, %c0_i32, %c0_i32_0, %c0_i32_1 : i32, i32, i32, i32
  }
  func.func @transform_1(%arg0: i32) -> (i32, i32, i32) {
    %c0_i32 = arith.constant 0 : i32
    %c0_i32_0 = arith.constant 0 : i32
    %c0_i32_1 = arith.constant 0 : i32
    %c0_i32_2 = arith.constant 0 : i32
    return %c0_i32, %c0_i32_0, %c0_i32_1 : i32, i32, i32
  }
  func.func @transform_2(%arg0: i32) -> (i32, i32) {
    %c0_i32 = arith.constant 0 : i32
    %c0_i32_0 = arith.constant 0 : i32
    %c0_i32_1 = arith.constant 0 : i32
    return %c0_i32, %c0_i32_0 : i32, i32
  }
  func.func @transform_3(%arg0: i32) -> (i32, i32) {
    %c0_i32 = arith.constant 0 : i32
    %c0_i32_0 = arith.constant 0 : i32
    return %arg0, %c0_i32 : i32, i32
  }
}

</mosaic_0001>

<bundles_post_ra>
// kernel: token_conv_forward.1
= control target key start
LH: loop header
LB: loop body
LE: loop exit
PB: predicated region body
PF: predicated region fallthrough
CT: control target
= control target key end

     0   :  { %v903_v3 = vmov 0.0|0.0   ;;  %vm904_vm0 = vmmov 0   ;;  %v905_v11 = vmov 0.0   ;;  %v906_v30 = vmov 1983009808   ;;  %s1209_s0 = inlined_call_operand.vmem [shape: f32[4,4,2,128], index: 0, kind: input, shape index: {}]   ;;  %s1210_s1 = inlined_call_operand.vmem [shape: f32[4,128,128], index: 1, kind: input, shape index: {}]   ;;  %s1211_s2 = inlined_call_operand.vmem [shape: f32[1,128], index: 2, kind: input, shape index: {}]   ;;  %s1212_s3 = inlined_call_operand.hbm [shape: f32[8,128], index: 3, kind: output, shape index: {}]  }
   0x1   :  { %v26_v0 = vld [vmem:[%s1210_s1] sm:$0xff]  ;;  %v27_v1 = vld [vmem:[%s1210_s1 + $0x8] sm:$0xff]  ;;  %764 = vmatprep.subr.bf16.mxu1 %v903_v3  ;;  %812 = vmatprep.subr.bf16.mxu0 %v903_v3  ;;  %v28_v6 = vld [vmem:[%s1210_s1 + $0x10] sm:$0xff]  ;;  %v49_v31 = vunpack.c.l.s4 %v906_v30  ;;  %v51_v32 = vlaneseq }
   0x2   :  { %v520_v2 = vld [vmem:[%s1210_s1 + $0x100] sm:$0xff]  ;;  %v765_v4 = vpack.c.bf16 %v27_v1, %v26_v0  ;;  %v521_v5 = vld [vmem:[%s1210_s1 + $0x108] sm:$0xff]  ;;  %v29_v7 = vld [vmem:[%s1210_s1 + $0x18] sm:$0xff]  ;;  %656 = vmatprep.mubr.msk.f32.mxu1 %vm904_vm0, %v905_v11  ;;  %726 = vmatprep.mubr.msk.f32.mxu0 %vm904_vm0, %v905_v11 }
   0x3   :  { %v813_v8 = vpack.c.bf16 %v521_v5, %v520_v2  ;;  %v522_v9 = vld [vmem:[%s1210_s1 + $0x110] sm:$0xff]  ;;  %v523_v10 = vld [vmem:[%s1210_s1 + $0x118] sm:$0xff]  ;;  %v768_v12 = vpack.c.bf16 %v29_v7, %v28_v6  ;;  %v30_v14 = vld [vmem:[%s1210_s1 + $0x20] sm:$0xff]  ;;  %v50_v39 = vunpack.c.0.s8 %v49_v31  ;;  %v52_v40 = vshrl.u32 %v51_v32, 7 }
   0x4   :  { %766 = vmatpush3.bf16.msra.mxu1 %v765_v4  ;;  %v816_v13 = vpack.c.bf16 %v523_v10, %v522_v9  ;;  %v31_v15 = vld [vmem:[%s1210_s1 + $0x28] sm:$0xff]  ;;  %v524_v16 = vld [vmem:[%s1210_s1 + $0x120] sm:$0xff]  ;;  %v32_v20 = vld [vmem:[%s1210_s1 + $0x30] sm:$0xff] }
   0x5   :  { %814 = vmatpush3.bf16.msra.mxu0 %v813_v8  ;;  %767 = vmatprep.subr.bf16.mxu1 %v903_v3  ;;  %v525_v17 = vld [vmem:[%s1210_s1 + $0x128] sm:$0xff]  ;;  %v771_v18 = vpack.c.bf16 %v31_v15, %v30_v14  ;;  %v33_v21 = vld [vmem:[%s1210_s1 + $0x38] sm:$0xff]  ;;  %v526_v22 = vld [vmem:[%s1210_s1 + $0x130] sm:$0xff]  ;;  %v1034_v49 = vsub.s32 %v50_v39, %v52_v40 }
   0x6   :  { %815 = vmatprep.subr.bf16.mxu0 %v903_v3  ;;  %v819_v19 = vpack.c.bf16 %v525_v17, %v524_v16  ;;  %v527_v23 = vld [vmem:[%s1210_s1 + $0x138] sm:$0xff]  ;;  %v774_v24 = vpack.c.bf16 %v33_v21, %v32_v20  ;;  %v34_v26 = vld [vmem:[%s1210_s1 + $0x40] sm:$0xff]  ;;  %v35_v27 = vld [vmem:[%s1210_s1 + $0x48] sm:$0xff] }
   0x7   :  { %v822_v25 = vpack.c.bf16 %v527_v23, %v526_v22  ;;  %v528_v28 = vld [vmem:[%s1210_s1 + $0x140] sm:$0xff]  ;;  %v529_v29 = vld [vmem:[%s1210_s1 + $0x148] sm:$0xff]  ;;  %v777_v33 = vpack.c.bf16 %v35_v27, %v34_v26  ;;  %v36_v35 = vld [vmem:[%s1210_s1 + $0x50] sm:$0xff] }
   0x8   :  { %769 = vmatpush3.bf16.msra.mxu1 %v768_v12  ;;  %v825_v34 = vpack.c.bf16 %v529_v29, %v528_v28  ;;  %v37_v36 = vld [vmem:[%s1210_s1 + $0x58] sm:$0xff]  ;;  %v530_v37 = vld [vmem:[%s1210_s1 + $0x150] sm:$0xff]  ;;  %v38_v43 = vld [vmem:[%s1210_s1 + $0x60] sm:$0xff] }
   0x9   :  { %817 = vmatpush3.bf16.msra.mxu0 %v816_v13  ;;  %770 = vmatprep.subr.bf16.mxu1 %v903_v3  ;;  %v531_v38 = vld [vmem:[%s1210_s1 + $0x158] sm:$0xff]  ;;  %v780_v41 = vpack.c.bf16 %v37_v36, %v36_v35  ;;  %v39_v44 = vld [vmem:[%s1210_s1 + $0x68] sm:$0xff]  ;;  %v532_v45 = vld [vmem:[%s1210_s1 + $0x160] sm:$0xff] }
   0xa   :  { %818 = vmatprep.subr.bf16.mxu0 %v903_v3  ;;  %v828_v42 = vpack.c.bf16 %v531_v38, %v530_v37  ;;  %v533_v46 = vld [vmem:[%s1210_s1 + $0x168] sm:$0xff]  ;;  %v872_v48 = vld [vmem:[%s1209_s0 + $0x10] ss:$8 sps:$4 sm:$0x33]   ;;  %v783_v50 = vpack.c.bf16 %v39_v44, %v38_v43  ;;  %v500_v61 = vld [vmem:[%s1210_s1 + $0x80] sm:$0xff] }
   0xb   :  { %v871_v47 = vld [vmem:[%s1209_s0] ss:$8 sps:$4 sm:$0x33]   ;;  %v873_v51 = vld [vmem:[%s1209_s0 + $0x4] ss:$8 sps:$4 sm:$0x33]   ;;  %v831_v53 = vpack.c.bf16 %v533_v46, %v532_v45  ;;  %v61_v59 = vrot.slane %v872_v48, %v1034_v49 }
   0xc   :  { %772 = vmatpush3.bf16.msra.mxu1 %v771_v18  ;;  %v874_v52 = vld [vmem:[%s1209_s0 + $0x14] ss:$8 sps:$4 sm:$0x33]   ;;  %v54_v58 = vrot.slane %v871_v47, %v1034_v49  ;;  %v501_v62 = vld [vmem:[%s1210_s1 + $0x88] sm:$0xff]  ;;  %v284_v63 = vrot.slane %v873_v51, %v1034_v49  ;;  %v540_v2 = vld [vmem:[%s1210_s1 + $0x180] sm:$0xff] }
   0xd   :  { %820 = vmatpush3.bf16.msra.mxu0 %v819_v19  ;;  %773 = vmatprep.subr.bf16.mxu1 %v903_v3  ;;  %v40_v54 = vld [vmem:[%s1210_s1 + $0x70] sm:$0xff]  ;;  %v41_v55 = vld [vmem:[%s1210_s1 + $0x78] sm:$0xff]  ;;  %v291_v0 = vrot.slane %v874_v52, %v1034_v49  ;;  %v541_v4 = vld [vmem:[%s1210_s1 + $0x188] sm:$0xff]  ;;  %v789_v6 = vpack.c.bf16 %v501_v62, %v500_v61 }
   0xe   :  { %821 = vmatprep.subr.bf16.mxu0 %v903_v3  ;;  %v534_v56 = vld [vmem:[%s1210_s1 + $0x170] sm:$0xff]  ;;  %v535_v57 = vld [vmem:[%s1210_s1 + $0x178] sm:$0xff]  ;;  %v786_v60 = vpack.c.bf16 %v41_v55, %v40_v54  ;;  %v62_v5 = vcombine.low %v54_v58, %v61_v59 }
   0xf   :  { %v834_v1 = vpack.c.bf16 %v535_v57, %v534_v56  ;;  %v292_v7 = vcombine.low %v284_v63, %v291_v0 }
  0x10   :  { %775 = vmatpush3.bf16.msra.mxu1 %v774_v24 }
  0x11   :  { %823 = vmatpush3.bf16.msra.mxu0 %v822_v25  ;;  %776 = vmatprep.subr.bf16.mxu1 %v903_v3 }
  0x12   :  { %824 = vmatprep.subr.bf16.mxu0 %v903_v3 }
  0x14   :  { %778 = vmatpush3.bf16.msra.mxu1 %v777_v33 }
  0x15   :  { %826 = vmatpush3.bf16.msra.mxu0 %v825_v34  ;;  %779 = vmatprep.subr.bf16.mxu1 %v903_v3 }
  0x16   :  { %827 = vmatprep.subr.bf16.mxu0 %v903_v3 }
  0x18   :  { %781 = vmatpush3.bf16.msra.mxu1 %v780_v41 }
  0x19   :  { %829 = vmatpush3.bf16.msra.mxu0 %v828_v42  ;;  %782 = vmatprep.subr.bf16.mxu1 %v903_v3 }
  0x1a   :  { %830 = vmatprep.subr.bf16.mxu0 %v903_v3 }
  0x1c   :  { %784 = vmatpush3.bf16.msra.mxu1 %v783_v50 }
  0x1d   :  { %832 = vmatpush3.bf16.msra.mxu0 %v831_v53  ;;  %785 = vmatprep.subr.bf16.mxu1 %v903_v3 }
  0x1e   :  { %833 = vmatprep.subr.bf16.mxu0 %v903_v3 }
  0x20   :  { %787 = vmatpush3.bf16.msra.mxu1 %v786_v60 }
  0x21   :  { %8 = vsyncpa [#allocation3], 0  ;;  %835 = vmatpush3.bf16.msra.mxu0 %v834_v1  ;;  %788 = vmatprep.subr.bf16.mxu1 %v903_v3  ;;  %v837_v8 = vpack.c.bf16 %v541_v4, %v540_v2  ;;  %v502_v9 = vld [vmem:[%s1210_s1 + $0x90] sm:$0xff]  ;;  %v503_v10 = vld [vmem:[%s1210_s1 + $0x98] sm:$0xff]  ;;  %s907_s21 = smov [#allocation2]  }
  0x22   :  { %836 = vmatprep.subr.bf16.mxu0 %v903_v3  ;;  %v542_v12 = vld [vmem:[%s1210_s1 + $0x190] sm:$0xff]  ;;  %v543_v13 = vld [vmem:[%s1210_s1 + $0x198] sm:$0xff]  ;;  %v792_v14 = vpack.c.bf16 %v503_v10, %v502_v9  ;;  %v504_v16 = vld [vmem:[%s1210_s1 + $0xa0] sm:$0xff]  ;;  %s487_s22 = sshll.u32 %s907_s21, 4  ;;  %s488_s22 = int_to_ptr.vmem [resolvable:$true] %s487_s22 }
  0x23   :  { %657 = vmatmul.mubr.f32.vlgmr.msra.gmra.mrb[0].mxu1 %v62_v5  ;;  %v840_v15 = vpack.c.bf16 %v543_v13, %v542_v12  ;;  %v505_v17 = vld [vmem:[%s1210_s1 + $0xa8] sm:$0xff]  ;;  %v544_v18 = vld [vmem:[%s1210_s1 + $0x1a0] sm:$0xff]  ;;  %v506_v22 = vld [vmem:[%s1210_s1 + $0xb0] sm:$0xff]  ;;  %s879_s23 = scalar_lea.vmem %s488_s22, 128  ;;  %p884_p1 = scmp.lt.s32.totalorder %s488_s22, %s488_s22 }
  0x24   :  { %790 = vmatpush3.bf16.msra.mxu1 %v789_v6  ;;  %727 = vmatmul.mubr.f32.vlgmr.msra.gmra.mrb[0].mxu0 %v292_v7  ;;  %v545_v19 = vld [vmem:[%s1210_s1 + $0x1a8] sm:$0xff]  ;;  %v795_v20 = vpack.c.bf16 %v505_v17, %v504_v16  ;;  %v507_v23 = vld [vmem:[%s1210_s1 + $0xb8] sm:$0xff]  ;;  %v508_v27 = vld [vmem:[%s1210_s1 + $0xc0] sm:$0xff]  ;;  %p880_p0 = scmp.ne.s32.totalorder %s488_s22, %s879_s23  ;;  %p885_p2 = scmp.lt.s32.totalorder %s879_s23, %s879_s23 }
  0x25   :  { %838 = vmatpush3.bf16.msra.mxu0 %v837_v8  ;;  %791 = vmatprep.subr.bf16.mxu1 %v903_v3  ;;  %v843_v21 = vpack.c.bf16 %v545_v19, %v544_v18  ;;  %v547_v24 = vld [vmem:[%s1210_s1 + $0x1b8] sm:$0xff]  ;;  %v798_v25 = vpack.c.bf16 %v507_v23, %v506_v22  ;;  %v509_v28 = vld [vmem:[%s1210_s1 + $0xc8] sm:$0xff]  ;;  %v548_v29 = vld [vmem:[%s1210_s1 + $0x1c0] sm:$0xff] }
  0x26   :  { %839 = vmatprep.subr.bf16.mxu0 %v903_v3  ;;  %691 = vmatprep.mubr.msk.f32.mxu1 %vm904_vm0, %v905_v11  ;;  %v549_v30 = vld [vmem:[%s1210_s1 + $0x1c8] sm:$0xff]  ;;  %v801_v31 = vpack.c.bf16 %v509_v28, %v508_v27  ;;  %v510_v33 = vld [vmem:[%s1210_s1 + $0xd0] sm:$0xff]  ;;  %v511_v34 = vld [vmem:[%s1210_s1 + $0xd8] sm:$0xff]  ;;  %p886_p3 = por %p885_p2, %p884_p1 }
  0x27   :  { %761 = vmatprep.mubr.msk.f32.mxu0 %vm904_vm0, %v905_v11  ;;  %v546_v11 = vld [vmem:[%s1210_s1 + $0x1b0] sm:$0xff]  ;;  %v849_v32 = vpack.c.bf16 %v549_v30, %v548_v29  ;;  %v551_v36 = vld [vmem:[%s1210_s1 + $0x1d8] sm:$0xff]  ;;  %v804_v37 = vpack.c.bf16 %v511_v34, %v510_v33  ;;  %v512_v39 = vld [vmem:[%s1210_s1 + $0xe0] sm:$0xff] }
  0x28   :  { %793 = vmatpush3.bf16.msra.mxu1 %v792_v14  ;;  %v846_v26 = vpack.c.bf16 %v547_v24, %v546_v11  ;;  %v550_v35 = vld [vmem:[%s1210_s1 + $0x1d0] sm:$0xff]  ;;  %v513_v40 = vld [vmem:[%s1210_s1 + $0xe8] sm:$0xff]  ;;  %v552_v41 = vld [vmem:[%s1210_s1 + $0x1e0] sm:$0xff]  ;;  %p887_p4 = pnand %p886_p3, %p880_p0 }
  0x29   :  { %841 = vmatpush3.bf16.msra.mxu0 %v840_v15  ;;  %794 = vmatprep.subr.bf16.mxu1 %v903_v3  ;;  %v852_v38 = vpack.c.bf16 %v551_v36, %v550_v35  ;;  %v553_v42 = vld [vmem:[%s1210_s1 + $0x1e8] sm:$0xff]  ;;  %v876_v44 = vld [vmem:[%s1209_s0 + $0x12] ss:$8 sps:$4 sm:$0x33]   ;;  %v807_v45 = vpack.c.bf16 %v513_v40, %v512_v39  ;;  %v495_v62 = vld [vmem:[%s1211_s2] ss:$0 sm:$0xff] }
  0x2a   :  { %842 = vmatprep.subr.bf16.mxu0 %v903_v3  ;;  %v875_v43 = vld [vmem:[%s1209_s0 + $0x2] ss:$8 sps:$4 sm:$0x33]   ;;  %v877_v46 = vld [vmem:[%s1209_s0 + $0x6] ss:$8 sps:$4 sm:$0x33]   ;;  %v855_v48 = vpack.c.bf16 %v553_v42, %v552_v41  ;;  %v176_v55 = vrot.slane %v876_v44, %v1034_v49 }
  0x2b   :  { %v878_v47 = vld [vmem:[%s1209_s0 + $0x16] ss:$8 sps:$4 sm:$0x33]   ;;  %v169_v54 = vrot.slane %v875_v43, %v1034_v49  ;;  %v399_v57 = vrot.slane %v877_v46, %v1034_v49 }
  0x2c   :  { %796 = vmatpush3.bf16.msra.mxu1 %v795_v20  ;;  %v514_v50 = vld [vmem:[%s1210_s1 + $0xf0] sm:$0xff]  ;;  %v515_v51 = vld [vmem:[%s1210_s1 + $0xf8] sm:$0xff]  ;;  %v406_v58 = vrot.slane %v878_v47, %v1034_v49 }
  0x2d   :  { %844 = vmatpush3.bf16.msra.mxu0 %v843_v21  ;;  %797 = vmatprep.subr.bf16.mxu1 %v903_v3  ;;  %v554_v52 = vld [vmem:[%s1210_s1 + $0x1f0] sm:$0xff]  ;;  %v555_v53 = vld [vmem:[%s1210_s1 + $0x1f8] sm:$0xff]  ;;  %v810_v56 = vpack.c.bf16 %v515_v51, %v514_v50  ;;  %v177_v60 = vcombine.low %v169_v54, %v176_v55 }
  0x2e   :  { %845 = vmatprep.subr.bf16.mxu0 %v903_v3  ;;  %v858_v59 = vpack.c.bf16 %v555_v53, %v554_v52  ;;  %v407_v61 = vcombine.low %v399_v57, %v406_v58 }
  0x30   :  { %799 = vmatpush3.bf16.msra.mxu1 %v798_v25 }
  0x31   :  { %847 = vmatpush3.bf16.msra.mxu0 %v846_v26  ;;  %800 = vmatprep.subr.bf16.mxu1 %v903_v3 }
  0x32   :  { %848 = vmatprep.subr.bf16.mxu0 %v903_v3 }
  0x34   :  { %802 = vmatpush3.bf16.msra.mxu1 %v801_v31 }
  0x35   :  { %850 = vmatpush3.bf16.msra.mxu0 %v849_v32  ;;  %803 = vmatprep.subr.bf16.mxu1 %v903_v3 }
  0x36   :  { %851 = vmatprep.subr.bf16.mxu0 %v903_v3 }
  0x38   :  { %805 = vmatpush3.bf16.msra.mxu1 %v804_v37 }
  0x39   :  { %853 = vmatpush3.bf16.msra.mxu0 %v852_v38  ;;  %806 = vmatprep.subr.bf16.mxu1 %v903_v3 }
  0x3a   :  { %854 = vmatprep.subr.bf16.mxu0 %v903_v3 }
  0x3c   :  { %808 = vmatpush3.bf16.msra.mxu1 %v807_v45 }
  0x3d   :  { %856 = vmatpush3.bf16.msra.mxu0 %v855_v48  ;;  %809 = vmatprep.subr.bf16.mxu1 %v903_v3 }
  0x3e   :  { %857 = vmatprep.subr.bf16.mxu0 %v903_v3 }
  0x40   :  { %811 = vmatpush3.bf16.msra.mxu1 %v810_v56 }
  0x41   :  { %859 = vmatpush3.bf16.msra.mxu0 %v858_v59 }
  0x43   :  { %692 = vmatmul.mubr.f32.vlgmr.msra.gmra.mrb[0].mxu1 %v177_v60 }
  0x44   :  { %762 = vmatmul.mubr.f32.vlgmr.msra.gmra.mrb[0].mxu0 %v407_v61 }
 0x116   :  { %v245_v63 = vpop.f32.mrb[0].mxu1 }
 0x117   :  { %v860_v49 = vadd.f32 %v495_v62, %v245_v63  ;;  %v475_v0 = vpop.f32.mrb[0].mxu0  ;;  %v693_v1 = vpop.f32.mrb[1].mxu1 }
 0x118   :  { %v763_v2 = vpop.f32.mrb[1].mxu0 }
 0x119   :  { %v861_v4 = vadd.f32 %v860_v49, %v475_v0 }
 0x11b   :  { %480 = vst [vmem:[#allocation2] sm:$0xff] %v861_v4 }
 0x11c   :  { %890 = shalt.err (!%p887_p4)
}
 0x11d   :  { %s891_s2 = scalar_lea.hbm %s1212_s3, 128 }
 0x11e   :  { %p892_p5 = scmp.ne.s32.totalorder %s1212_s3, %s891_s2  ;;  %p895_p6 = scmp.lt.u32.totalorder %s891_s2, %s1212_s3 }
 0x120   :  { %p897_p7 = pnand %p895_p6, %p892_p5 }
 0x122   :  { %900 = shalt.err (!%p897_p7)
}
 0x123   :  { %490 = dma.vmem_to_hbm [thread:$0]  %s488_s22, 128, %s1212_s3, [#allocation3]  }
 0x124   :  { %901 = dma.done.wait [#allocation3], 128  }
 0x125   :  { %902 = vsyncadd [#allocation3], 4294967168 }
 0x126   :  { %494 = vsyncpa [#allocation3], 1 }

</bundles_post_ra>
